<compile_context>
chip_gen: v5e
topology: v5e:2x2
jax: 0.10.0
libtpu: 0.0.40
codegen_flags: <defaults>
</compile_context>

<pallas_src>
import jax
import jax.numpy as jnp
from jax.experimental import pallas as pl
from jax.experimental.pallas import tpu as pltpu


def _round_up(x, m):
    return ((x + m - 1) // m) * m


def _cdiv(a, b):
    return (a + b - 1) // b


def _mlp_kernel(x_ref, w1_ref, b1_ref, w2_ref, b2_ref, w3_ref, b3_ref, o_ref):
    # In-kernel bf16 cast of the input tile (VPU); f32 MXU accumulation.
    x = x_ref[...].astype(jnp.bfloat16)
    # Layer 1: Linear + bias/ReLU in f32.
    h1 = jnp.dot(x, w1_ref[...], preferred_element_type=jnp.float32)
    h1 = jnp.maximum(h1 + b1_ref[...], 0.0)
    # Layer 2: Linear + ReLU.
    h2 = jnp.dot(h1.astype(jnp.bfloat16), w2_ref[...],
                 preferred_element_type=jnp.float32)
    h2 = jnp.maximum(h2 + b2_ref[...], 0.0)
    # Output layer: Linear (Identity activation), stored unpadded.
    out = jnp.dot(h2.astype(jnp.bfloat16), w3_ref[...],
                  preferred_element_type=jnp.float32)
    o_ref[...] = (out + b3_ref[...]).astype(o_ref.dtype)


def _choose_tile_b(batch):
    # Largest MXU-friendly tile that still gives >= 2 grid steps (pipelining /
    # megacore sharding); among those, prefer an even grid (v7x has 2 TCs).
    candidates = (2048, 1024, 512, 256, 128)
    viable = [t for t in candidates if batch >= 2 * t]
    if viable:
        for t in viable:
            if _cdiv(batch, t) % 2 == 0:
                return t
        return viable[0]
    if batch > 128:
        return 128
    return _round_up(max(batch, 16), 16)


def _vmem_bytes_estimate(tile_b, obs_dim, d1, d2, n_modes):
    # x tile (f32) + out tile (f32), double-buffered; h1/h2 temps (f32 + bf16);
    # bf16 weights (conservatively counted twice) + f32 biases.
    act = tile_b * (obs_dim * 4 * 2
                    + n_modes * 4 * 2
                    + (d1 + d2) * (4 + 2))
    wts = 2 * ((obs_dim * d1 + d1 * d2 + d2 * n_modes) * 2
               + (d1 + d2 + n_modes) * 4)
    return act + wts


def prepare_params(params):
    """One-time param prep: matmul weights -> bf16, biases stay f32 (1, out)."""
    w1, b1, w2, b2, w3, b3 = params
    return (w1.astype(jnp.bfloat16), b1.astype(jnp.float32),
            w2.astype(jnp.bfloat16), b2.astype(jnp.float32),
            w3.astype(jnp.bfloat16), b3.astype(jnp.float32))


def mlp_mode_prediction(obs, params, *, tile_b=None, force_pallas=False):
    """Fused 3-layer MLP forward. obs: (B, obs_dim) float32 -> (B, n_modes)."""
    w1, b1, w2, b2, w3, b3 = params
    B, obs_dim = obs.shape
    d1 = w1.shape[1]
    d2 = w2.shape[1]
    n_modes = w3.shape[1]

    # Very tiny batches: per-call overhead still dominates; plain XLA path.
    if not force_pallas and B < 16:
        return reference_forward(obs, params)

    if tile_b is None:
        tile_b = _choose_tile_b(B)
    tile_b = min(_round_up(tile_b, 16), _round_up(B, 16))

    # Ensure bf16 matmul weights (no-op if prepare_params was already used).
    w1c = w1 if w1.dtype == jnp.bfloat16 else w1.astype(jnp.bfloat16)
    w2c = w2 if w2.dtype == jnp.bfloat16 else w2.astype(jnp.bfloat16)
    w3c = w3 if w3.dtype == jnp.bfloat16 else w3.astype(jnp.bfloat16)

    grid = (_cdiv(B, tile_b),)
    vmem_limit = int(min(
        max(2 * _vmem_bytes_estimate(tile_b, obs_dim, d1, d2, n_modes),
            8 * 1024 * 1024),
        32 * 1024 * 1024))

    out = pl.pallas_call(
        _mlp_kernel,
        out_shape=jax.ShapeDtypeStruct((B, n_modes), obs.dtype),
        grid_spec=pltpu.PrefetchScalarGridSpec(
            num_scalar_prefetch=0,
            grid=grid,
            in_specs=[
                pl.BlockSpec((tile_b, obs_dim), lambda i: (i, 0)),   # x tile
                pl.BlockSpec((obs_dim, d1), lambda i: (0, 0)),       # W1
                pl.BlockSpec((1, d1), lambda i: (0, 0)),             # b1
                pl.BlockSpec((d1, d2), lambda i: (0, 0)),            # W2
                pl.BlockSpec((1, d2), lambda i: (0, 0)),             # b2
                pl.BlockSpec((d2, n_modes), lambda i: (0, 0)),       # W3
                pl.BlockSpec((1, n_modes), lambda i: (0, 0)),        # b3
            ],
            out_specs=pl.BlockSpec((tile_b, n_modes), lambda i: (i, 0)),
        ),
        compiler_params=pltpu.CompilerParams(
            dimension_semantics=("parallel",),
            vmem_limit_bytes=vmem_limit,
        ),
    )(obs, w1c, b1, w2c, b2, w3c, b3)

    return out


def init_params(key, obs_dim, hidden_sizes, n_modes):
    """PyTorch-Linear-style uniform(-1/sqrt(fan_in), 1/sqrt(fan_in)) init.
    Weights are returned already transposed to (in, out); biases as (1, out)."""
    sizes = [obs_dim] + list(hidden_sizes) + [n_modes]
    params = []
    for j in range(len(sizes) - 1):
        fan_in, fan_out = sizes[j], sizes[j + 1]
        key, kw, kb = jax.random.split(key, 3)
        bound = 1.0 / jnp.sqrt(jnp.float32(fan_in))
        w = jax.random.uniform(kw, (fan_in, fan_out), jnp.float32, -bound, bound)
        b = jax.random.uniform(kb, (1, fan_out), jnp.float32, -bound, bound)
        params += [w, b]
    return tuple(params)


def reference_forward(obs, params):
    w1, b1, w2, b2, w3, b3 = params
    h1 = jnp.maximum(obs @ w1 + b1, 0.0)
    h2 = jnp.maximum(h1 @ w2 + b2, 0.0)
    return h2 @ w3 + b3


if __name__ == "__main__":
    # Small shapes consistent with the module's forward: obs (B, obs_dim).
    # B=200 is deliberately NOT a multiple of the tile so the multi-step
    # grid=(2,) path with a partial boundary block is exercised.
    B, obs_dim = 200, 32
    hidden_sizes = (256, 256)   # module default
    n_modes = 8

    key = jax.random.PRNGKey(0)
    key, k_obs = jax.random.split(key)
    obs = jax.random.normal(k_obs, (B, obs_dim), jnp.float32)
    params = init_params(key, obs_dim, hidden_sizes, n_modes)

    # One-time weight prep (bf16) outside the hot path.
    prepped = prepare_params(params)

    out = mlp_mode_prediction(obs, prepped, force_pallas=True)
    out = jax.block_until_ready(out)

    ref = reference_forward(obs, params)
    assert out.shape == (B, n_modes)
    # bf16 matmul operands (f32 accumulation) vs pure-f32 reference.
    assert jnp.allclose(out, ref, atol=5e-2, rtol=5e-2), "mismatch vs reference"

    print("KERNEL_OK")
</pallas_src>

<mosaic_0001>
module attributes {stable_mosaic.version = 11 : i64} {
  func.func @_mlp_kernel(%arg0: i32, %arg1: memref<128x32xf32, #tpu.memory_space<vmem>>, %arg2: memref<32x256xbf16, #tpu.memory_space<vmem>>, %arg3: memref<1x256xf32, #tpu.memory_space<vmem>>, %arg4: memref<256x256xbf16, #tpu.memory_space<vmem>>, %arg5: memref<1x256xf32, #tpu.memory_space<vmem>>, %arg6: memref<256x8xbf16, #tpu.memory_space<vmem>>, %arg7: memref<1x8xf32, #tpu.memory_space<vmem>>, %arg8: memref<128x8xf32, #tpu.memory_space<vmem>>) attributes {dimension_semantics = [#tpu.dimension_semantics<parallel>], iteration_bounds = array<i64: 2>, scalar_prefetch = 0 : i64, scratch_operands = 0 : i64, tpu.core_type = #tpu.core_type<tc>, window_params = [{transform_indices = @transform_0, window_bounds = array<i64: 128, 32>}, {pipeline_mode = #tpu.pipeline_mode<synchronous>, transform_indices = @transform_1, window_bounds = array<i64: 32, 256>}, {pipeline_mode = #tpu.pipeline_mode<synchronous>, transform_indices = @transform_2, window_bounds = array<i64: 1, 256>}, {pipeline_mode = #tpu.pipeline_mode<synchronous>, transform_indices = @transform_3, window_bounds = array<i64: 256, 256>}, {pipeline_mode = #tpu.pipeline_mode<synchronous>, transform_indices = @transform_4, window_bounds = array<i64: 1, 256>}, {pipeline_mode = #tpu.pipeline_mode<synchronous>, transform_indices = @transform_5, window_bounds = array<i64: 256, 8>}, {pipeline_mode = #tpu.pipeline_mode<synchronous>, transform_indices = @transform_6, window_bounds = array<i64: 1, 8>}, {transform_indices = @transform_7, window_bounds = array<i64: 128, 8>}]} {
    %c0 = arith.constant 0 : index
    %c0_0 = arith.constant 0 : index
    %0 = vector.load %arg1[%c0, %c0_0] : memref<128x32xf32, #tpu.memory_space<vmem>>, vector<128x32xf32>
    %1 = arith.truncf %0 : vector<128x32xf32> to vector<128x32xbf16>
    %c0_1 = arith.constant 0 : index
    %c0_2 = arith.constant 0 : index
    %2 = vector.load %arg2[%c0_1, %c0_2] : memref<32x256xbf16, #tpu.memory_space<vmem>>, vector<32x256xbf16>
    %cst = arith.constant dense<0.000000e+00> : vector<128x256xf32>
    %3 = tpu.matmul %1, %2, %cst {dimension_numbers = #tpu.dot_dimension_numbers<[1], [0], [0], [1], [0, 0, 1, 1], [], []>} : vector<128x32xbf16>, vector<32x256xbf16>, vector<128x256xf32> -> vector<128x256xf32>
    %c0_3 = arith.constant 0 : index
    %c0_4 = arith.constant 0 : index
    %4 = vector.load %arg3[%c0_3, %c0_4] : memref<1x256xf32, #tpu.memory_space<vmem>>, vector<1x256xf32>
    %5 = vector.broadcast %4 : vector<1x256xf32> to vector<128x256xf32>
    %6 = arith.addf %3, %5 : vector<128x256xf32>
    %cst_5 = arith.constant 0.000000e+00 : f32
    %7 = vector.broadcast %cst_5 : f32 to vector<128x256xf32>
    %8 = arith.maximumf %6, %7 : vector<128x256xf32>
    %9 = arith.truncf %8 : vector<128x256xf32> to vector<128x256xbf16>
    %c0_6 = arith.constant 0 : index
    %c0_7 = arith.constant 0 : index
    %10 = vector.load %arg4[%c0_6, %c0_7] : memref<256x256xbf16, #tpu.memory_space<vmem>>, vector<256x256xbf16>
    %cst_8 = arith.constant dense<0.000000e+00> : vector<128x256xf32>
    %11 = tpu.matmul %9, %10, %cst_8 {dimension_numbers = #tpu.dot_dimension_numbers<[1], [0], [0], [1], [0, 0, 1, 1], [], []>} : vector<128x256xbf16>, vector<256x256xbf16>, vector<128x256xf32> -> vector<128x256xf32>
    %c0_9 = arith.constant 0 : index
    %c0_10 = arith.constant 0 : index
    %12 = vector.load %arg5[%c0_9, %c0_10] : memref<1x256xf32, #tpu.memory_space<vmem>>, vector<1x256xf32>
    %13 = vector.broadcast %12 : vector<1x256xf32> to vector<128x256xf32>
    %14 = arith.addf %11, %13 : vector<128x256xf32>
    %cst_11 = arith.constant 0.000000e+00 : f32
    %15 = vector.broadcast %cst_11 : f32 to vector<128x256xf32>
    %16 = arith.maximumf %14, %15 : vector<128x256xf32>
    %17 = arith.truncf %16 : vector<128x256xf32> to vector<128x256xbf16>
    %c0_12 = arith.constant 0 : index
    %c0_13 = arith.constant 0 : index
    %18 = vector.load %arg6[%c0_12, %c0_13] : memref<256x8xbf16, #tpu.memory_space<vmem>>, vector<256x8xbf16>
    %cst_14 = arith.constant dense<0.000000e+00> : vector<128x8xf32>
    %19 = tpu.matmul %17, %18, %cst_14 {dimension_numbers = #tpu.dot_dimension_numbers<[1], [0], [0], [1], [0, 0, 1, 1], [], []>} : vector<128x256xbf16>, vector<256x8xbf16>, vector<128x8xf32> -> vector<128x8xf32>
    %c0_15 = arith.constant 0 : index
    %c0_16 = arith.constant 0 : index
    %20 = vector.load %arg7[%c0_15, %c0_16] : memref<1x8xf32, #tpu.memory_space<vmem>>, vector<1x8xf32>
    %21 = vector.broadcast %20 : vector<1x8xf32> to vector<128x8xf32>
    %22 = arith.addf %19, %21 : vector<128x8xf32>
    %c0_17 = arith.constant 0 : index
    %c0_18 = arith.constant 0 : index
    %23 = vector.load %arg8[%c0_17, %c0_18] : memref<128x8xf32, #tpu.memory_space<vmem>>, vector<128x8xf32>
    tpu.vector_store %arg8[%c0_17, %c0_18], %22 {strides = array<i32>} : memref<128x8xf32, #tpu.memory_space<vmem>>, vector<128x8xf32>,
    return
  }
  func.func @transform_0(%arg0: i32) -> (i32, i32) {
    %c0_i32 = arith.constant 0 : i32
    %c0_i32_0 = arith.constant 0 : i32
    return %arg0, %c0_i32 : i32, i32
  }
  func.func @transform_1(%arg0: i32) -> (i32, i32) {
    %c0_i32 = arith.constant 0 : i32
    %c0_i32_0 = arith.constant 0 : i32
    %c0_i32_1 = arith.constant 0 : i32
    return %c0_i32, %c0_i32_0 : i32, i32
  }
  func.func @transform_2(%arg0: i32) -> (i32, i32) {
    %c0_i32 = arith.constant 0 : i32
    %c0_i32_0 = arith.constant 0 : i32
    %c0_i32_1 = arith.constant 0 : i32
    return %c0_i32, %c0_i32_0 : i32, i32
  }
  func.func @transform_3(%arg0: i32) -> (i32, i32) {
    %c0_i32 = arith.constant 0 : i32
    %c0_i32_0 = arith.constant 0 : i32
    %c0_i32_1 = arith.constant 0 : i32
    return %c0_i32, %c0_i32_0 : i32, i32
  }
  func.func @transform_4(%arg0: i32) -> (i32, i32) {
    %c0_i32 = arith.constant 0 : i32
    %c0_i32_0 = arith.constant 0 : i32
    %c0_i32_1 = arith.constant 0 : i32
    return %c0_i32, %c0_i32_0 : i32, i32
  }
  func.func @transform_5(%arg0: i32) -> (i32, i32) {
    %c0_i32 = arith.constant 0 : i32
    %c0_i32_0 = arith.constant 0 : i32
    %c0_i32_1 = arith.constant 0 : i32
    return %c0_i32, %c0_i32_0 : i32, i32
  }
  func.func @transform_6(%arg0: i32) -> (i32, i32) {
    %c0_i32 = arith.constant 0 : i32
    %c0_i32_0 = arith.constant 0 : i32
    %c0_i32_1 = arith.constant 0 : i32
    return %c0_i32, %c0_i32_0 : i32, i32
  }
  func.func @transform_7(%arg0: i32) -> (i32, i32) {
    %c0_i32 = arith.constant 0 : i32
    %c0_i32_0 = arith.constant 0 : i32
    return %arg0, %c0_i32 : i32, i32
  }
}

</mosaic_0001>

<bundles_post_ra>
// kernel: tpu_custom_call.1
= control target key start
LH: loop header
LB: loop body
LE: loop exit
PB: predicated region body
PF: predicated region fallthrough
CT: control target
= control target key end

     0   :  { %s2011_s24 = smov 0   ;;  %s2013_s25 = smov 0   ;;  %s2584_s0 = inlined_call_operand.vmem [shape: f32[200,32], index: 0, kind: input, shape index: {}]   ;;  %s2585_s1 = inlined_call_operand.vmem [shape: bf16[32,256], index: 1, kind: input, shape index: {}]   ;;  %s2586_s2 = inlined_call_operand.vmem [shape: f32[1,256], index: 2, kind: input, shape index: {}]   ;;  %s2587_s3 = inlined_call_operand.vmem [shape: bf16[256,256], index: 3, kind: input, shape index: {}]   ;;  %s2588_s4 = inlined_call_operand.vmem [shape: f32[1,256], index: 4, kind: input, shape index: {}]   ;;  %s2589_s5 = inlined_call_operand.vmem [shape: bf16[256,8], index: 5, kind: input, shape index: {}]   ;;  %s2590_s6 = inlined_call_operand.vmem [shape: f32[1,8], index: 6, kind: input, shape index: {}]   ;;  %s2591_s7 = inlined_call_operand.vmem [shape: f32[200,8], index: 7, kind: output, shape index: {}]  }
   0x1   :  { %s2015_s26 = smov 0  }
   0x2 LB: > { %s2024_s27 = sadd.s32 4294967295, %s1937_s26   ;;  %s2026_s28 = sadd.s32 1, %s1937_s26   ;;  %s1937_s26 = sphi %s2015_s26, %s2600_s26   ;;  %s1933_s25 = sphi %s2013_s25, %s2599_s25   ;;  %s1929_s24 = sphi %s2011_s24, %s2598_s24  }
   0x3   : > { %s173_s29 = ssub.s32 %s1937_s26, %s2026_s28  ;;  %s176_s30 = sadd.s32 1, %s1933_s25 }
   0x4   : > { %p174_p0 = scmp.eq.s32.totalorder %s173_s29, 0  ;;  %p186_p1 = scmp.ne.s32.totalorder %s1933_s25, %s1929_s24 }
   0x5   : > { %p187_p2 = scmp.eq.s32.totalorder %s2024_s27, 1  ;;  %p1494_p3 = scmp.ge.s32.totalorder %s1937_s26, 1 }
   0x6   : > { %s2034_s8 = scalar_select %p174_p0, %s1933_s25, %s176_s30  }
   0x7   : > { %p2036_p4 = por %p187_p2, %p186_p1  ;;  %p246_p5 = scmp.lt.s32.totalorder %s1937_s26, 3 }
   0x9   : > { %p247_p6 = pnand %p1494_p3, %p246_p5 }
   0xa   : > { %s2065_s30 = sshll.u32 (!%p247_p6), %s2024_s27, 4  ;;  %s278_s10 = sand.u32 (!%p247_p6), 1, %s1929_s24  }
   0xb   : > { %250 = sbr.rel (%p247_p6) target bundleno = 619 (0x26b), region = 48  ;;  %p286_p7 = scmp.lt.s32.totalorder (!%p247_p6), %s2065_s30, 24 }
   0xc   : > { %s1495_s13 = sshll.u32 (!%p247_p6), %s278_s10, 7 }
   0xd   : > { %s2431_s14 = scalar_lea.vmem (!%p247_p6), [#allocation2], %s1495_s13  }
  0x10   : > { %v1508_v0 = vld [vmem:[%s2585_s1 + $0x10] sm:$0xf]  ;;  %v1742_v1 = vld [vmem:[%s2585_s1 + $0x14] sm:$0xf0]  ;;  %v1741_v2 = vld [vmem:[%s2585_s1 + $0x14] sm:$0xf] }
  0x11   : > { %v1509_v3 = vor.u32 %v1742_v1, %v1508_v0  ;;  %v1510_v4 = vld [vmem:[%s2585_s1 + $0x18] sm:$0xf0]  ;;  %v1500_v5 = vld [vmem:[%s2585_s1] sm:$0xf]  ;;  %v1740_v6 = vld [vmem:[%s2585_s1 + $0x4] sm:$0xf0] }
  0x12   : > { %v1513_v7 = vor.u32 %v1741_v2, %v1510_v4  ;;  %v1739_v8 = vld [vmem:[%s2585_s1 + $0x4] sm:$0xf]  ;;  %v1502_v9 = vld [vmem:[%s2585_s1 + $0x8] sm:$0xf0]  ;;  %v1501_v10 = vor.u32 %v1740_v6, %v1500_v5  ;;  %v1757_v11 = vld [vmem:[%s2587_s3 + $0x74] sm:$0xf] }
  0x13   : > { %386 = vmatpush.bf16.msra.mxu0 %v1509_v3  ;;  %v1590_v12 = vld [vmem:[%s2587_s3 + $0x78] sm:$0xf0]  ;;  %v1505_v13 = vor.u32 %v1739_v8, %v1502_v9  ;;  %v1773_v15 = vld [vmem:[%s2587_s3 + $0xf4] sm:$0xf]  ;;  %s287_s18 = scalar_select %p286_p7, %s2065_s30, 24  ;;  %vm355_vm0 = vcmask 261120  }
  0x14   : > { %435 = vmatpush.bf16.msra.mxu1 %v1513_v7  ;;  %v1593_v14 = vor.u32 %v1757_v11, %v1590_v12  ;;  %v1654_v16 = vld [vmem:[%s2587_s3 + $0xf8] sm:$0xf0]  ;;  %v1755_v21 = vld [vmem:[%s2587_s3 + $0x64] sm:$0xf]  ;;  %v1582_v22 = vld [vmem:[%s2587_s3 + $0x68] sm:$0xf0] }
  0x15   : > { %v1657_v17 = vor.u32 %v1773_v15, %v1654_v16  ;;  %s1497_s19 = sshll.u32 %s287_s18, 3  ;;  %v1771_v23 = vld [vmem:[%s2587_s3 + $0xe4] sm:$0xf]  ;;  %v1585_v24 = vor.u32 %v1755_v21, %v1582_v22  ;;  %v1646_v25 = vld [vmem:[%s2587_s3 + $0xe8] sm:$0xf0]  ;;  %vm1198_vm1 = vcmask 64512  }
  0x16   : > { %s2084_s22 = scalar_lea.vmem %s2584_s0, %s1497_s19  ;;  %v1649_v26 = vor.u32 %v1771_v23, %v1646_v25  ;;  %v1753_v30 = vld [vmem:[%s2587_s3 + $0x54] sm:$0xf]  ;;  %v1574_v31 = vld [vmem:[%s2587_s3 + $0x58] sm:$0xf0]  ;;  %v1751_v39 = vld [vmem:[%s2587_s3 + $0x44] sm:$0xf] }
  0x17   : > { %387 = vmatpush.bf16.msra.mxu0 %v1501_v10  ;;  %v301_v18 = vld [vmem:[%s2084_s22] sm:$0xff]  ;;  %v302_v19 = vld [vmem:[%s2084_s22 + $0x8] sm:$0xff]  ;;  %v303_v27 = vld [vmem:[%s2084_s22 + $0x10] sm:$0xff]  ;;  %v1577_v33 = vor.u32 %v1753_v30, %v1574_v31  ;;  %s1223_s24 = ssub.s32 (%p2036_p4), 25, %s2065_s30  ;;  %s1791_s15 = sshll.u32 (%p2036_p4), %s2024_s27, 7 }
  0x18   : > { %436 = vmatpush.bf16.msra.mxu1 %v1505_v13  ;;  %v317_v20 = vpack.c.bf16 %v302_v19, %v301_v18  ;;  %v304_v28 = vld [vmem:[%s2084_s22 + $0x18] sm:$0xff]  ;;  %v1769_v32 = vld [vmem:[%s2587_s3 + $0xd4] sm:$0xf]  ;;  %v305_v36 = vld [vmem:[%s2084_s22 + $0x20] sm:$0xff]  ;;  %p1224_p8 = scmp.lt.s32.totalorder (%p2036_p4), %s1223_s24, 16  ;;  %s2487_s18 = scalar_lea.vmem (%p2036_p4), %s2591_s7, %s1791_s15  }
  0x19   : > { %v318_v29 = vpack.c.bf16 %v304_v28, %v303_v27  ;;  %v1638_v34 = vld [vmem:[%s2587_s3 + $0xd8] sm:$0xf0]  ;;  %v306_v37 = vld [vmem:[%s2084_s22 + $0x28] sm:$0xff]  ;;  %v1767_v41 = vld [vmem:[%s2587_s3 + $0xc4] sm:$0xf] }
  0x1a   : > { %1514 = vmatmul.msk.bf16.vlgmr.msra.gmra.mxu0 %vm355_vm0, %v317_v20  ;;  %v1641_v35 = vor.u32 %v1769_v32, %v1638_v34  ;;  %v319_v38 = vpack.c.bf16 %v306_v37, %v305_v36  ;;  %v1566_v40 = vld [vmem:[%s2587_s3 + $0x48] sm:$0xf0]  ;;  %v307_v45 = vld [vmem:[%s2084_s22 + $0x30] sm:$0xff]  ;;  %v308_v46 = vld [vmem:[%s2084_s22 + $0x38] sm:$0xff] }
  0x1b   : > { %822 = vmatpush.bf16.msrb.mxu0 %v1593_v14  ;;  %1522 = vmatmul.msk.bf16.vlgmr.msra.gmra.mxu1 %vm355_vm0, %v317_v20  ;;  %v1569_v42 = vor.u32 %v1751_v39, %v1566_v40  ;;  %v1630_v43 = vld [vmem:[%s2587_s3 + $0xc8] sm:$0xf0]  ;;  %v320_v47 = vpack.c.bf16 %v308_v46, %v307_v45  ;;  %v1749_v48 = vld [vmem:[%s2587_s3 + $0x34] sm:$0xf]  ;;  %v1558_v49 = vld [vmem:[%s2587_s3 + $0x38] sm:$0xf0] }
  0x1c   : > { %871 = vmatpush.bf16.msrb.mxu1 %v1657_v17  ;;  %v1633_v44 = vor.u32 %v1767_v41, %v1630_v43  ;;  %v1765_v50 = vld [vmem:[%s2587_s3 + $0xb4] sm:$0xf]  ;;  %v1561_v51 = vor.u32 %v1749_v48, %v1558_v49  ;;  %v1622_v52 = vld [vmem:[%s2587_s3 + $0xb8] sm:$0xf0]  ;;  %v309_v54 = vld [vmem:[%s2084_s22 + $0x40] sm:$0xff] }
  0x1d   : > { %v1625_v53 = vor.u32 %v1765_v50, %v1622_v52  ;;  %v310_v55 = vld [vmem:[%s2084_s22 + $0x48] sm:$0xff]  ;;  %v1747_v57 = vld [vmem:[%s2587_s3 + $0x24] sm:$0xf]  ;;  %v1588_v62 = vld [vmem:[%s2587_s3 + $0x70] sm:$0xf] }
  0x1e   : > { %v321_v56 = vpack.c.bf16 %v310_v55, %v309_v54  ;;  %v1550_v58 = vld [vmem:[%s2587_s3 + $0x28] sm:$0xf0]  ;;  %v1763_v59 = vld [vmem:[%s2587_s3 + $0xa4] sm:$0xf]  ;;  %v1758_v63 = vld [vmem:[%s2587_s3 + $0x74] sm:$0xf0] }
  0x1f   : > { %823 = vmatpush.bf16.msrb.mxu0 %v1585_v24  ;;  %v1553_v60 = vor.u32 %v1747_v57, %v1550_v58  ;;  %v1614_v61 = vld [vmem:[%s2587_s3 + $0xa8] sm:$0xf0]  ;;  %v1589_v1 = vor.u32 %v1758_v63, %v1588_v62  ;;  %v1652_v2 = vld [vmem:[%s2587_s3 + $0xf0] sm:$0xf]  ;;  %v1774_v3 = vld [vmem:[%s2587_s3 + $0xf4] sm:$0xf0] }
  0x20   : > { %872 = vmatpush.bf16.msrb.mxu1 %v1649_v26  ;;  %v1617_v0 = vor.u32 %v1763_v59, %v1614_v61  ;;  %v1653_v4 = vor.u32 %v1774_v3, %v1652_v2  ;;  %v311_v5 = vld [vmem:[%s2084_s22 + $0x50] sm:$0xff]  ;;  %v312_v6 = vld [vmem:[%s2084_s22 + $0x58] sm:$0xff]  ;;  %v1580_v8 = vld [vmem:[%s2587_s3 + $0x60] sm:$0xf] }
  0x21   : > { %724 = vmatpush.bf16.msra.mxu2 %v1589_v1  ;;  %v322_v7 = vpack.c.bf16 %v312_v6, %v311_v5  ;;  %v1756_v9 = vld [vmem:[%s2587_s3 + $0x64] sm:$0xf0]  ;;  %v1644_v10 = vld [vmem:[%s2587_s3 + $0xe0] sm:$0xf]  ;;  %v1745_v14 = vld [vmem:[%s2587_s3 + $0x14] sm:$0xf] }
  0x22   : > { %773 = vmatpush.bf16.msra.mxu3 %v1653_v4  ;;  %v1581_v11 = vor.u32 %v1756_v9, %v1580_v8  ;;  %v1772_v12 = vld [vmem:[%s2587_s3 + $0xe4] sm:$0xf0]  ;;  %v1542_v15 = vld [vmem:[%s2587_s3 + $0x18] sm:$0xf0]  ;;  %v1572_v16 = vld [vmem:[%s2587_s3 + $0x50] sm:$0xf] }
  0x23   : > { %824 = vmatpush.bf16.msrb.mxu0 %v1577_v33  ;;  %v1645_v13 = vor.u32 %v1772_v12, %v1644_v10  ;;  %v1545_v17 = vor.u32 %v1745_v14, %v1542_v15  ;;  %v1754_v18 = vld [vmem:[%s2587_s3 + $0x54] sm:$0xf0]  ;;  %v1636_v19 = vld [vmem:[%s2587_s3 + $0xd0] sm:$0xf]  ;;  %v1761_v23 = vld [vmem:[%s2587_s3 + $0x94] sm:$0xf] }
  0x24   : > { %873 = vmatpush.bf16.msrb.mxu1 %v1641_v35  ;;  %v1770_v20 = vld [vmem:[%s2587_s3 + $0xd4] sm:$0xf0]  ;;  %v1573_v21 = vor.u32 %v1754_v18, %v1572_v16  ;;  %v1606_v24 = vld [vmem:[%s2587_s3 + $0x98] sm:$0xf0]  ;;  %v1564_v25 = vld [vmem:[%s2587_s3 + $0x40] sm:$0xf] }
  0x25   : > { %725 = vmatpush.bf16.msra.mxu2 %v1581_v11  ;;  %v1637_v22 = vor.u32 %v1770_v20, %v1636_v19  ;;  %v1609_v26 = vor.u32 %v1761_v23, %v1606_v24  ;;  %v1752_v27 = vld [vmem:[%s2587_s3 + $0x44] sm:$0xf0]  ;;  %v1628_v28 = vld [vmem:[%s2587_s3 + $0xc0] sm:$0xf]  ;;  %v1556_v34 = vld [vmem:[%s2587_s3 + $0x30] sm:$0xf] }
  0x26   : > { %774 = vmatpush.bf16.msra.mxu3 %v1645_v13  ;;  %v1565_v30 = vor.u32 %v1752_v27, %v1564_v25  ;;  %v313_v32 = vld [vmem:[%s2084_s22 + $0x60] sm:$0xff]  ;;  %v314_v33 = vld [vmem:[%s2084_s22 + $0x68] sm:$0xff]  ;;  %v1750_v35 = vld [vmem:[%s2587_s3 + $0x34] sm:$0xf0] }
  0x27   : > { %825 = vmatpush.bf16.msrb.mxu0 %v1569_v42  ;;  %v1620_v36 = vld [vmem:[%s2587_s3 + $0xb0] sm:$0xf]  ;;  %v1557_v37 = vor.u32 %v1750_v35, %v1556_v34  ;;  %v323_v39 = vpack.c.bf16 %v314_v33, %v313_v32  ;;  %v1548_v41 = vld [vmem:[%s2587_s3 + $0x20] sm:$0xf]  ;;  %v1748_v42 = vld [vmem:[%s2587_s3 + $0x24] sm:$0xf0] }
  0x28   : > { %874 = vmatpush.bf16.msrb.mxu1 %v1633_v44  ;;  %v1549_v43 = vor.u32 %v1748_v42, %v1548_v41  ;;  %v1612_v44 = vld [vmem:[%s2587_s3 + $0xa0] sm:$0xf]  ;;  %v1764_v45 = vld [vmem:[%s2587_s3 + $0xa4] sm:$0xf0]  ;;  %v1534_v48 = vld [vmem:[%s2587_s3 + $0x8] sm:$0xf0] }
  0x29   : > { %726 = vmatpush.bf16.msra.mxu2 %v1573_v21  ;;  %v1613_v46 = vor.u32 %v1764_v45, %v1612_v44  ;;  %v1540_v50 = vld [vmem:[%s2587_s3 + $0x10] sm:$0xf]  ;;  %v1762_v54 = vld [vmem:[%s2587_s3 + $0x94] sm:$0xf0]  ;;  %v1598_v57 = vld [vmem:[%s2587_s3 + $0x88] sm:$0xf0] }
  0x2a   : > { %1515 = vmatmul.msk.bf16.gmra.mxu0 %vm355_vm0, %v318_v29  ;;  %775 = vmatpush.bf16.msra.mxu3 %v1637_v22  ;;  %v1604_v52 = vld [vmem:[%s2587_s3 + $0x90] sm:$0xf]  ;;  %v1532_v58 = vld [vmem:[%s2587_s3] sm:$0xf]  ;;  %v1760_v62 = vld [vmem:[%s2587_s3 + $0x84] sm:$0xf0] }
  0x2b   : > { %1523 = vmatmul.msk.bf16.gmra.mxu1 %vm355_vm0, %v318_v29  ;;  %826 = vmatpush.bf16.msrb.mxu0 %v1561_v51  ;;  %v1768_v29 = vld [vmem:[%s2587_s3 + $0xc4] sm:$0xf0]  ;;  %v1746_v51 = vld [vmem:[%s2587_s3 + $0x14] sm:$0xf0]  ;;  %v1605_v55 = vor.u32 %v1762_v54, %v1604_v52  ;;  %v1596_v61 = vld [vmem:[%s2587_s3 + $0x80] sm:$0xf] }
  0x2c   : > { %875 = vmatpush.bf16.msrb.mxu1 %v1625_v53  ;;  %v1629_v31 = vor.u32 %v1768_v29, %v1628_v28  ;;  %v1541_v53 = vor.u32 %v1746_v51, %v1540_v50  ;;  %v315_v1 = vld [vmem:[%s2084_s22 + $0x70] sm:$0xff]  ;;  %v316_v2 = vld [vmem:[%s2084_s22 + $0x78] sm:$0xff]  ;;  %v329_v4 = vld [vmem:[%s2586_s2] sm:$0x3] }
  0x2d   : > { %727 = vmatpush.bf16.msra.mxu2 %v1565_v30  ;;  %v324_v3 = vpack.c.bf16 %v316_v2, %v315_v1  ;;  %v2303_v8 = vperm.slane %v329_v4, 1  ;;  %v1782_v9 = vld [vmem:[%s2589_s5 + $0x38] sm:$0xff]  ;;  %v1781_v25 = vld [vmem:[%s2589_s5 + $0x30] sm:$0xff]  ;;  %v1780_v41 = vld [vmem:[%s2589_s5 + $0x28] sm:$0xff] }
  0x2e   : > { %776 = vmatpush.bf16.msra.mxu3 %v1629_v31  ;;  %v1790_v10 = vld [vmem:[%s2589_s5 + $0x78] sm:$0xff]  ;;  %v1788_v42 = vld [vmem:[%s2589_s5 + $0x68] sm:$0xff] }
  0x2f   : > { %827 = vmatpush.bf16.msrb.mxu0 %v1553_v60  ;;  %v1744_v60 = vld [vmem:[%s2587_s3 + $0x4] sm:$0xf0] }
  0x30   : > { %876 = vmatpush.bf16.msrb.mxu1 %v1617_v0  ;;  %v1533_v63 = vor.u32 %v1744_v60, %v1532_v58  ;;  %v1597_v0 = vor.u32 %v1760_v62, %v1596_v61  ;;  %v1787_v58 = vld [vmem:[%s2589_s5 + $0x60] sm:$0xff] }
  0x31   : > { %728 = vmatpush.bf16.msra.mxu2 %v1557_v37 }
  0x33   : > { %828 = vmatpush.bf16.msrb.mxu0 %v1545_v17 }
  0x34   : > { %877 = vmatpush.bf16.msrb.mxu1 %v1609_v26  ;;  %v1789_v26 = vld [vmem:[%s2589_s5 + $0x70] sm:$0xff] }
  0x35   : > { %729 = vmatpush.bf16.msra.mxu2 %v1549_v43 }
  0x39   : > { %730 = vmatpush.bf16.msra.mxu2 %v1541_v53 }
  0x3a   : > { %1516 = vmatmul.msk.bf16.gmra.mxu0 %vm355_vm0, %v319_v38 }
  0x3b   : > { %1524 = vmatmul.msk.bf16.gmra.mxu1 %vm355_vm0, %v319_v38  ;;  %v1766_v38 = vld [vmem:[%s2587_s3 + $0xb4] sm:$0xf0] }
  0x3c   : > { %v1621_v40 = vor.u32 %v1766_v38, %v1620_v36 }
  0x3d   : > { %731 = vmatpush.bf16.msra.mxu2 %v1533_v63 }
  0x3e   : > { %777 = vmatpush.bf16.msra.mxu3 %v1621_v40 }
  0x41   : > { %1100 = vmatpush.bf16.msrb.mxu2 %v1782_v9 }
  0x42   : > { %778 = vmatpush.bf16.msra.mxu3 %v1613_v46 }
  0x45   : > { %1101 = vmatpush.bf16.msrb.mxu2 %v1781_v25 }
  0x46   : > { %779 = vmatpush.bf16.msra.mxu3 %v1605_v55 }
  0x49   : > { %1102 = vmatpush.bf16.msrb.mxu2 %v1780_v41 }
  0x4a   : > { %1517 = vmatmul.msk.bf16.gmra.mxu0 %vm355_vm0, %v320_v47  ;;  %780 = vmatpush.bf16.msra.mxu3 %v1597_v0 }
  0x4b   : > { %1525 = vmatmul.msk.bf16.gmra.mxu1 %vm355_vm0, %v320_v47  ;;  %v1743_v47 = vld [vmem:[%s2587_s3 + $0x4] sm:$0xf] }
  0x4c   : > { %v1537_v49 = vor.u32 %v1743_v47, %v1534_v48 }
  0x4e   : > { %829 = vmatpush.bf16.msrb.mxu0 %v1537_v49  ;;  %1149 = vmatpush.bf16.msrb.mxu3 %v1790_v10 }
  0x52   : > { %1150 = vmatpush.bf16.msrb.mxu3 %v1789_v26 }
  0x56   : > { %1151 = vmatpush.bf16.msrb.mxu3 %v1788_v42 }
  0x5a   : > { %1518 = vmatmul.msk.bf16.gmra.mxu0 %vm355_vm0, %v321_v56  ;;  %1152 = vmatpush.bf16.msrb.mxu3 %v1787_v58 }
  0x5b   : > { %1526 = vmatmul.msk.bf16.gmra.mxu1 %vm355_vm0, %v321_v56  ;;  %v1759_v56 = vld [vmem:[%s2587_s3 + $0x84] sm:$0xf] }
  0x5c   : > { %v1601_v59 = vor.u32 %v1759_v56, %v1598_v57  ;;  %v1779_v57 = vld [vmem:[%s2589_s5 + $0x20] sm:$0xff] }
  0x5d   : > { %1103 = vmatpush.bf16.msrb.mxu2 %v1779_v57 }
  0x5e   : > { %878 = vmatpush.bf16.msrb.mxu1 %v1601_v59 }
  0x6a   : > { %1519 = vmatmul.msk.bf16.gmra.mxu0 %vm355_vm0, %v322_v7 }
  0x6b   : > { %1527 = vmatmul.msk.bf16.gmra.mxu1 %vm355_vm0, %v322_v7  ;;  %v2301_v7 = vperm.slane %v329_v4, 0 }
  0x7a   : > { %1520 = vmatmul.msk.bf16.gmra.mxu0 %vm355_vm0, %v323_v39 }
  0x7b   : > { %1528 = vmatmul.msk.bf16.gmra.mxu1 %vm355_vm0, %v323_v39 }
  0x8a   : > { %1521 = vmatmul.msk.bf16.gmra.mxu0 %vm355_vm0, %v324_v3 }
  0x8b   : > { %1529 = vmatmul.msk.bf16.gmra.mxu1 %vm355_vm0, %v324_v3 }
  0x97   : > { %v389_v5 = vpop.f32.mrf.mxu0 }
  0x98   : > { %v438_v6 = vpop.f32.mrf.mxu1  ;;  %v390_v11 = vadd.f32 %v389_v5, %v2301_v7 }
  0x99   : > { %v439_v12 = vadd.f32 %v438_v6, %v2303_v8 }
  0x9a   : > { %v478_v17 = vmax.f32 %v390_v11, 0.0  ;;  %v1778_v11 = vld [vmem:[%s2589_s5 + $0x18] sm:$0xff] }
  0x9b   : > { %v479_v18 = vmax.f32 %v439_v12, 0.0  ;;  %v1786_v12 = vld [vmem:[%s2589_s5 + $0x58] sm:$0xff]  ;;  %1104 = vmatpush.bf16.msrb.mxu2 %v1778_v11 }
  0x9c   : > { %1153 = vmatpush.bf16.msrb.mxu3 %v1786_v12 }
  0x9f   : > { %v391_v13 = vpop.f32.mrf.mxu0 }
  0xa0   : > { %v440_v14 = vpop.f32.mrf.mxu1  ;;  %v392_v15 = vadd.f32 %v391_v13, %v2301_v7 }
  0xa1   : > { %v441_v16 = vadd.f32 %v440_v14, %v2303_v8 }
  0xa2   : > { %v480_v19 = vmax.f32 %v392_v15, 0.0 }
  0xa3   : > { %v481_v20 = vmax.f32 %v441_v16, 0.0 }
  0xa4   : > { %v510_v21 = vpack.c.bf16 %v480_v19, %v478_v17 }
  0xa5   : > { %v511_v22 = vpack.c.bf16 %v481_v20, %v479_v18 }
  0xa6   : > { %732 = vmatmul.bf16.vlgmr.msra.gmra.mxu2 %v510_v21  ;;  %830 = vmatmul.bf16.vlgmr.msrb.gmra.mxu0 %v510_v21 }
  0xa7   : > { %781 = vmatmul.bf16.vlgmr.msra.gmra.mxu3 %v511_v22  ;;  %879 = vmatmul.bf16.vlgmr.msrb.gmra.mxu1 %v511_v22  ;;  %v394_v23 = vpop.f32.mrf.mxu0 }
  0xa8   : > { %v443_v24 = vpop.f32.mrf.mxu1  ;;  %v395_v27 = vadd.f32 %v394_v23, %v2301_v7 }
  0xa9   : > { %v444_v28 = vadd.f32 %v443_v24, %v2303_v8 }
  0xaa   : > { %v482_v33 = vmax.f32 %v395_v27, 0.0  ;;  %v1777_v27 = vld [vmem:[%s2589_s5 + $0x10] sm:$0xff] }
  0xab   : > { %v483_v34 = vmax.f32 %v444_v28, 0.0  ;;  %v1785_v28 = vld [vmem:[%s2589_s5 + $0x50] sm:$0xff]  ;;  %1105 = vmatpush.bf16.msrb.mxu2 %v1777_v27 }
  0xac   : > { %1154 = vmatpush.bf16.msrb.mxu3 %v1785_v28 }
  0xaf   : > { %v396_v29 = vpop.f32.mrf.mxu0 }
  0xb0   : > { %v445_v30 = vpop.f32.mrf.mxu1  ;;  %v397_v31 = vadd.f32 %v396_v29, %v2301_v7 }
  0xb1   : > { %v446_v32 = vadd.f32 %v445_v30, %v2303_v8 }
  0xb2   : > { %v484_v35 = vmax.f32 %v397_v31, 0.0 }
  0xb3   : > { %v485_v36 = vmax.f32 %v446_v32, 0.0 }
  0xb4   : > { %v512_v37 = vpack.c.bf16 %v484_v35, %v482_v33 }
  0xb5   : > { %v513_v38 = vpack.c.bf16 %v485_v36, %v483_v34 }
  0xb6   : > { %737 = vmatmul.bf16.gmra.mxu2 %v512_v37  ;;  %835 = vmatmul.bf16.gmra.mxu0 %v512_v37 }
  0xb7   : > { %786 = vmatmul.bf16.gmra.mxu3 %v513_v38  ;;  %884 = vmatmul.bf16.gmra.mxu1 %v513_v38  ;;  %v399_v39 = vpop.f32.mrf.mxu0 }
  0xb8   : > { %v448_v40 = vpop.f32.mrf.mxu1  ;;  %v400_v43 = vadd.f32 %v399_v39, %v2301_v7 }
  0xb9   : > { %v449_v44 = vadd.f32 %v448_v40, %v2303_v8 }
  0xba   : > { %v486_v49 = vmax.f32 %v400_v43, 0.0  ;;  %v1776_v43 = vld [vmem:[%s2589_s5 + $0x8] sm:$0xff] }
  0xbb   : > { %v487_v50 = vmax.f32 %v449_v44, 0.0  ;;  %v1784_v44 = vld [vmem:[%s2589_s5 + $0x48] sm:$0xff]  ;;  %1106 = vmatpush.bf16.msrb.mxu2 %v1776_v43 }
  0xbc   : > { %1155 = vmatpush.bf16.msrb.mxu3 %v1784_v44 }
  0xbf   : > { %v401_v45 = vpop.f32.mrf.mxu0 }
  0xc0   : > { %v450_v46 = vpop.f32.mrf.mxu1  ;;  %v402_v47 = vadd.f32 %v401_v45, %v2301_v7 }
  0xc1   : > { %v451_v48 = vadd.f32 %v450_v46, %v2303_v8 }
  0xc2   : > { %v488_v51 = vmax.f32 %v402_v47, 0.0 }
  0xc3   : > { %v489_v52 = vmax.f32 %v451_v48, 0.0 }
  0xc4   : > { %v514_v53 = vpack.c.bf16 %v488_v51, %v486_v49 }
  0xc5   : > { %v515_v54 = vpack.c.bf16 %v489_v52, %v487_v50 }
  0xc6   : > { %742 = vmatmul.bf16.gmra.mxu2 %v514_v53  ;;  %840 = vmatmul.bf16.gmra.mxu0 %v514_v53 }
  0xc7   : > { %791 = vmatmul.bf16.gmra.mxu3 %v515_v54  ;;  %889 = vmatmul.bf16.gmra.mxu1 %v515_v54  ;;  %v404_v55 = vpop.f32.mrf.mxu0 }
  0xc8   : > { %v453_v56 = vpop.f32.mrf.mxu1  ;;  %v405_v59 = vadd.f32 %v404_v55, %v2301_v7 }
  0xc9   : > { %v454_v60 = vadd.f32 %v453_v56, %v2303_v8 }
  0xca   : > { %v490_v1 = vmax.f32 %v405_v59, 0.0 }
  0xcb   : > { %v491_v2 = vmax.f32 %v454_v60, 0.0 }
  0xcf   : > { %v406_v61 = vpop.f32.mrf.mxu0 }
  0xd0   : > { %v455_v62 = vpop.f32.mrf.mxu1  ;;  %v407_v63 = vadd.f32 %v406_v61, %v2301_v7  ;;  %v1775_v61 = vld [vmem:[%s2589_s5] sm:$0xff] }
  0xd1   : > { %v456_v0 = vadd.f32 %v455_v62, %v2303_v8  ;;  %1107 = vmatpush.bf16.msrb.mxu2 %v1775_v61 }
  0xd2   : > { %v492_v3 = vmax.f32 %v407_v63, 0.0 }
  0xd3   : > { %v493_v4 = vmax.f32 %v456_v0, 0.0 }
  0xd4   : > { %v516_v5 = vpack.c.bf16 %v492_v3, %v490_v1 }
  0xd5   : > { %v517_v6 = vpack.c.bf16 %v493_v4, %v491_v2  ;;  %v1783_v2 = vld [vmem:[%s2589_s5 + $0x40] sm:$0xff] }
  0xd6   : > { %747 = vmatmul.bf16.gmra.mxu2 %v516_v5  ;;  %845 = vmatmul.bf16.gmra.mxu0 %v516_v5 }
  0xd7   : > { %796 = vmatmul.bf16.gmra.mxu3 %v517_v6  ;;  %894 = vmatmul.bf16.gmra.mxu1 %v517_v6  ;;  %v409_v9 = vpop.f32.mrf.mxu0 }
  0xd8   : > { %v458_v10 = vpop.f32.mrf.mxu1  ;;  %v410_v13 = vadd.f32 %v409_v9, %v2301_v7  ;;  %1156 = vmatpush.bf16.msrb.mxu3 %v1783_v2 }
  0xd9   : > { %v459_v14 = vadd.f32 %v458_v10, %v2303_v8 }
  0xda   : > { %v494_v19 = vmax.f32 %v410_v13, 0.0 }
  0xdb   : > { %v495_v20 = vmax.f32 %v459_v14, 0.0 }
  0xdf   : > { %v411_v15 = vpop.f32.mrf.mxu0 }
  0xe0   : > { %v460_v16 = vpop.f32.mrf.mxu1  ;;  %v412_v17 = vadd.f32 %v411_v15, %v2301_v7 }
  0xe1   : > { %v461_v18 = vadd.f32 %v460_v16, %v2303_v8 }
  0xe2   : > { %v496_v21 = vmax.f32 %v412_v17, 0.0 }
  0xe3   : > { %v497_v22 = vmax.f32 %v461_v18, 0.0 }
  0xe4   : > { %v518_v23 = vpack.c.bf16 %v496_v21, %v494_v19 }
  0xe5   : > { %v519_v24 = vpack.c.bf16 %v497_v22, %v495_v20 }
  0xe6   : > { %752 = vmatmul.bf16.gmra.mxu2 %v518_v23  ;;  %850 = vmatmul.bf16.gmra.mxu0 %v518_v23 }
  0xe7   : > { %801 = vmatmul.bf16.gmra.mxu3 %v519_v24  ;;  %899 = vmatmul.bf16.gmra.mxu1 %v519_v24  ;;  %v414_v25 = vpop.f32.mrf.mxu0 }
  0xe8   : > { %v463_v26 = vpop.f32.mrf.mxu1  ;;  %v415_v29 = vadd.f32 %v414_v25, %v2301_v7 }
  0xe9   : > { %v464_v30 = vadd.f32 %v463_v26, %v2303_v8 }
  0xea   : > { %v498_v35 = vmax.f32 %v415_v29, 0.0 }
  0xeb   : > { %v499_v36 = vmax.f32 %v464_v30, 0.0 }
  0xef   : > { %v416_v31 = vpop.f32.mrf.mxu0 }
  0xf0   : > { %v465_v32 = vpop.f32.mrf.mxu1  ;;  %v417_v33 = vadd.f32 %v416_v31, %v2301_v7 }
  0xf1   : > { %v466_v34 = vadd.f32 %v465_v32, %v2303_v8 }
  0xf2   : > { %v500_v37 = vmax.f32 %v417_v33, 0.0 }
  0xf3   : > { %v501_v38 = vmax.f32 %v466_v34, 0.0 }
  0xf4   : > { %v520_v39 = vpack.c.bf16 %v500_v37, %v498_v35 }
  0xf5   : > { %v521_v40 = vpack.c.bf16 %v501_v38, %v499_v36 }
  0xf6   : > { %757 = vmatmul.bf16.gmra.mxu2 %v520_v39  ;;  %855 = vmatmul.bf16.gmra.mxu0 %v520_v39 }
  0xf7   : > { %806 = vmatmul.bf16.gmra.mxu3 %v521_v40  ;;  %904 = vmatmul.bf16.gmra.mxu1 %v521_v40  ;;  %v419_v41 = vpop.f32.mrf.mxu0 }
  0xf8   : > { %v468_v42 = vpop.f32.mrf.mxu1  ;;  %v420_v45 = vadd.f32 %v419_v41, %v2301_v7 }
  0xf9   : > { %v469_v46 = vadd.f32 %v468_v42, %v2303_v8 }
  0xfa   : > { %v502_v51 = vmax.f32 %v420_v45, 0.0 }
  0xfb   : > { %v503_v52 = vmax.f32 %v469_v46, 0.0 }
  0xff   : > { %v421_v47 = vpop.f32.mrf.mxu0 }
 0x100   : > { %v470_v48 = vpop.f32.mrf.mxu1  ;;  %v422_v49 = vadd.f32 %v421_v47, %v2301_v7 }
 0x101   : > { %v471_v50 = vadd.f32 %v470_v48, %v2303_v8 }
 0x102   : > { %v504_v53 = vmax.f32 %v422_v49, 0.0 }
 0x103   : > { %v505_v54 = vmax.f32 %v471_v50, 0.0 }
 0x104   : > { %v522_v55 = vpack.c.bf16 %v504_v53, %v502_v51 }
 0x105   : > { %v523_v56 = vpack.c.bf16 %v505_v54, %v503_v52 }
 0x106   : > { %762 = vmatmul.bf16.gmra.mxu2 %v522_v55  ;;  %860 = vmatmul.bf16.gmra.mxu0 %v522_v55 }
 0x107   : > { %811 = vmatmul.bf16.gmra.mxu3 %v523_v56  ;;  %909 = vmatmul.bf16.gmra.mxu1 %v523_v56  ;;  %v424_v57 = vpop.f32.mrf.mxu0 }
 0x108   : > { %v473_v58 = vpop.f32.mrf.mxu1  ;;  %v425_v59 = vadd.f32 %v424_v57, %v2301_v7 }
 0x109   : > { %v474_v60 = vadd.f32 %v473_v58, %v2303_v8 }
 0x10a   : > { %v506_v3 = vmax.f32 %v425_v59, 0.0 }
 0x10b   : > { %v507_v4 = vmax.f32 %v474_v60, 0.0 }
 0x10f   : > { %v426_v62 = vpop.f32.mrf.mxu0 }
 0x110   : > { %v475_v63 = vpop.f32.mrf.mxu1  ;;  %v427_v0 = vadd.f32 %v426_v62, %v2301_v7  ;;  %v558_v7 = vld [vmem:[%s2588_s4] sm:$0x3] }
 0x111   : > { %v476_v1 = vadd.f32 %v475_v63, %v2303_v8  ;;  %v2388_v12 = vperm.slane %v558_v7, 1  ;;  %v2391_v16 = vperm.slane %v558_v7, 0 }
 0x112   : > { %v508_v5 = vmax.f32 %v427_v0, 0.0 }
 0x113   : > { %v509_v6 = vmax.f32 %v476_v1, 0.0 }
 0x114   : > { %v524_v9 = vpack.c.bf16 %v508_v5, %v506_v3 }
 0x115   : > { %v525_v10 = vpack.c.bf16 %v509_v6, %v507_v4 }
 0x116   : > { %767 = vmatmul.bf16.gmra.mxu2 %v524_v9  ;;  %865 = vmatmul.bf16.gmra.mxu0 %v524_v9 }
 0x117   : > { %816 = vmatmul.bf16.gmra.mxu3 %v525_v10  ;;  %914 = vmatmul.bf16.gmra.mxu1 %v525_v10 }
 0x123   : > { %v831_v8 = vpop.f32.mrf.mxu0 }
 0x124   : > { %v880_v11 = vpop.f32.mrf.mxu1  ;;  %v832_v13 = vadd.f32 %v831_v8, %v2388_v12 }
 0x126   : > { %v881_v19 = vadd.f32 %v880_v11, %v832_v13 }
 0x128   : > { %v921_v23 = vmax.f32 %v881_v19, 0.0 }
 0x129   : > { %v733_v14 = vpop.f32.mrf.mxu2 }
 0x12a   : > { %v782_v15 = vpop.f32.mrf.mxu3  ;;  %v734_v21 = vadd.f32 %v733_v14, %v2391_v16 }
 0x12b   : > { %v833_v17 = vpop.f32.mrf.mxu0 }
 0x12c   : > { %v882_v18 = vpop.f32.mrf.mxu1  ;;  %v834_v20 = vadd.f32 %v833_v17, %v2388_v12  ;;  %v783_v27 = vadd.f32 %v782_v15, %v734_v21 }
 0x12e   : > { %v883_v22 = vadd.f32 %v882_v18, %v834_v20  ;;  %v920_v33 = vmax.f32 %v783_v27, 0.0 }
 0x130   : > { %v923_v24 = vmax.f32 %v883_v22, 0.0 }
 0x131   : > { %v735_v25 = vpop.f32.mrf.mxu2 }
 0x132   : > { %v784_v26 = vpop.f32.mrf.mxu3  ;;  %v736_v28 = vadd.f32 %v735_v25, %v2391_v16  ;;  %v953_v29 = vpack.c.bf16 %v923_v24, %v921_v23 }
 0x133   : > { %v836_v31 = vpop.f32.mrf.mxu0 }
 0x134   : > { %v785_v30 = vadd.f32 %v784_v26, %v736_v28  ;;  %v885_v32 = vpop.f32.mrf.mxu1  ;;  %1157 = vmatmul.bf16.vlgmr.msrb.gmra.mxu3 %v953_v29  ;;  %v837_v36 = vadd.f32 %v836_v31, %v2388_v12 }
 0x136   : > { %v922_v34 = vmax.f32 %v785_v30, 0.0  ;;  %v886_v41 = vadd.f32 %v885_v32, %v837_v36 }
 0x138   : > { %v952_v35 = vpack.c.bf16 %v922_v34, %v920_v33  ;;  %v925_v45 = vmax.f32 %v886_v41, 0.0 }
 0x139   : > { %v738_v37 = vpop.f32.mrf.mxu2 }
 0x13a   : > { %v787_v38 = vpop.f32.mrf.mxu3  ;;  %1108 = vmatmul.bf16.vlgmr.msrb.gmra.mxu2 %v952_v35  ;;  %v739_v43 = vadd.f32 %v738_v37, %v2391_v16 }
 0x13b   : > { %v838_v39 = vpop.f32.mrf.mxu0 }
 0x13c   : > { %v887_v40 = vpop.f32.mrf.mxu1  ;;  %v839_v42 = vadd.f32 %v838_v39, %v2388_v12  ;;  %v788_v49 = vadd.f32 %v787_v38, %v739_v43 }
 0x13e   : > { %v888_v44 = vadd.f32 %v887_v40, %v839_v42  ;;  %v924_v55 = vmax.f32 %v788_v49, 0.0 }
 0x140   : > { %v927_v46 = vmax.f32 %v888_v44, 0.0 }
 0x141   : > { %v740_v47 = vpop.f32.mrf.mxu2 }
 0x142   : > { %v789_v48 = vpop.f32.mrf.mxu3  ;;  %v741_v50 = vadd.f32 %v740_v47, %v2391_v16  ;;  %v955_v51 = vpack.c.bf16 %v927_v46, %v925_v45 }
 0x143   : > { %v841_v53 = vpop.f32.mrf.mxu0 }
 0x144   : > { %v790_v52 = vadd.f32 %v789_v48, %v741_v50  ;;  %v890_v54 = vpop.f32.mrf.mxu1  ;;  %1162 = vmatmul.bf16.gmra.mxu3 %v955_v51  ;;  %v842_v58 = vadd.f32 %v841_v53, %v2388_v12 }
 0x146   : > { %v926_v56 = vmax.f32 %v790_v52, 0.0  ;;  %v891_v63 = vadd.f32 %v890_v54, %v842_v58 }
 0x148   : > { %v954_v57 = vpack.c.bf16 %v926_v56, %v924_v55  ;;  %v929_v3 = vmax.f32 %v891_v63, 0.0 }
 0x149   : > { %v743_v59 = vpop.f32.mrf.mxu2 }
 0x14a   : > { %v792_v60 = vpop.f32.mrf.mxu3  ;;  %1113 = vmatmul.bf16.gmra.mxu2 %v954_v57  ;;  %v744_v1 = vadd.f32 %v743_v59, %v2391_v16 }
 0x14b   : > { %v843_v61 = vpop.f32.mrf.mxu0 }
 0x14c   : > { %v892_v62 = vpop.f32.mrf.mxu1  ;;  %v844_v0 = vadd.f32 %v843_v61, %v2388_v12  ;;  %v793_v9 = vadd.f32 %v792_v60, %v744_v1 }
 0x14e   : > { %v893_v2 = vadd.f32 %v892_v62, %v844_v0  ;;  %v928_v14 = vmax.f32 %v793_v9, 0.0 }
 0x150   : > { %v931_v4 = vmax.f32 %v893_v2, 0.0 }
 0x151   : > { %v745_v5 = vpop.f32.mrf.mxu2 }
 0x152   : > { %v794_v6 = vpop.f32.mrf.mxu3  ;;  %v746_v10 = vadd.f32 %v745_v5, %v2391_v16  ;;  %v957_v7 = vpack.c.bf16 %v931_v4, %v929_v3 }
 0x153   : > { %v846_v11 = vpop.f32.mrf.mxu0 }
 0x154   : > { %v795_v8 = vadd.f32 %v794_v6, %v746_v10  ;;  %v895_v13 = vpop.f32.mrf.mxu1  ;;  %1167 = vmatmul.bf16.gmra.mxu3 %v957_v7  ;;  %v847_v18 = vadd.f32 %v846_v11, %v2388_v12 }
 0x156   : > { %v930_v15 = vmax.f32 %v795_v8, 0.0  ;;  %v896_v23 = vadd.f32 %v895_v13, %v847_v18 }
 0x158   : > { %v956_v17 = vpack.c.bf16 %v930_v15, %v928_v14  ;;  %v933_v27 = vmax.f32 %v896_v23, 0.0 }
 0x159   : > { %v748_v19 = vpop.f32.mrf.mxu2 }
 0x15a   : > { %v797_v20 = vpop.f32.mrf.mxu3  ;;  %1118 = vmatmul.bf16.gmra.mxu2 %v956_v17  ;;  %v749_v25 = vadd.f32 %v748_v19, %v2391_v16 }
 0x15b   : > { %v848_v21 = vpop.f32.mrf.mxu0 }
 0x15c   : > { %v897_v22 = vpop.f32.mrf.mxu1  ;;  %v849_v24 = vadd.f32 %v848_v21, %v2388_v12  ;;  %v798_v31 = vadd.f32 %v797_v20, %v749_v25 }
 0x15e   : > { %v898_v26 = vadd.f32 %v897_v22, %v849_v24  ;;  %v932_v37 = vmax.f32 %v798_v31, 0.0 }
 0x160   : > { %v935_v28 = vmax.f32 %v898_v26, 0.0 }
 0x161   : > { %v750_v29 = vpop.f32.mrf.mxu2 }
 0x162   : > { %v799_v30 = vpop.f32.mrf.mxu3  ;;  %v751_v32 = vadd.f32 %v750_v29, %v2391_v16  ;;  %v959_v33 = vpack.c.bf16 %v935_v28, %v933_v27 }
 0x163   : > { %v851_v35 = vpop.f32.mrf.mxu0 }
 0x164   : > { %v800_v34 = vadd.f32 %v799_v30, %v751_v32  ;;  %v900_v36 = vpop.f32.mrf.mxu1  ;;  %1172 = vmatmul.bf16.gmra.mxu3 %v959_v33  ;;  %v852_v40 = vadd.f32 %v851_v35, %v2388_v12 }
 0x166   : > { %v934_v38 = vmax.f32 %v800_v34, 0.0  ;;  %v901_v45 = vadd.f32 %v900_v36, %v852_v40 }
 0x168   : > { %v958_v39 = vpack.c.bf16 %v934_v38, %v932_v37  ;;  %v937_v49 = vmax.f32 %v901_v45, 0.0 }
 0x169   : > { %v753_v41 = vpop.f32.mrf.mxu2 }
 0x16a   : > { %v802_v42 = vpop.f32.mrf.mxu3  ;;  %1123 = vmatmul.bf16.gmra.mxu2 %v958_v39  ;;  %v754_v47 = vadd.f32 %v753_v41, %v2391_v16 }
 0x16b   : > { %v853_v43 = vpop.f32.mrf.mxu0 }
 0x16c   : > { %v902_v44 = vpop.f32.mrf.mxu1  ;;  %v854_v46 = vadd.f32 %v853_v43, %v2388_v12  ;;  %v803_v53 = vadd.f32 %v802_v42, %v754_v47 }
 0x16e   : > { %v903_v48 = vadd.f32 %v902_v44, %v854_v46  ;;  %v936_v59 = vmax.f32 %v803_v53, 0.0 }
 0x170   : > { %v939_v50 = vmax.f32 %v903_v48, 0.0 }
 0x171   : > { %v755_v51 = vpop.f32.mrf.mxu2 }
 0x172   : > { %v804_v52 = vpop.f32.mrf.mxu3  ;;  %v756_v54 = vadd.f32 %v755_v51, %v2391_v16  ;;  %v961_v55 = vpack.c.bf16 %v939_v50, %v937_v49 }
 0x173   : > { %v856_v57 = vpop.f32.mrf.mxu0 }
 0x174   : > { %v805_v56 = vadd.f32 %v804_v52, %v756_v54  ;;  %v905_v58 = vpop.f32.mrf.mxu1  ;;  %1177 = vmatmul.bf16.gmra.mxu3 %v961_v55  ;;  %v857_v62 = vadd.f32 %v856_v57, %v2388_v12 }
 0x176   : > { %v938_v60 = vmax.f32 %v805_v56, 0.0  ;;  %v906_v3 = vadd.f32 %v905_v58, %v857_v62 }
 0x178   : > { %v960_v61 = vpack.c.bf16 %v938_v60, %v936_v59  ;;  %v941_v9 = vmax.f32 %v906_v3, 0.0 }
 0x179   : > { %v758_v63 = vpop.f32.mrf.mxu2 }
 0x17a   : > { %v807_v0 = vpop.f32.mrf.mxu3  ;;  %1128 = vmatmul.bf16.gmra.mxu2 %v960_v61  ;;  %v759_v5 = vadd.f32 %v758_v63, %v2391_v16 }
 0x17b   : > { %v858_v1 = vpop.f32.mrf.mxu0 }
 0x17c   : > { %v907_v2 = vpop.f32.mrf.mxu1  ;;  %v859_v4 = vadd.f32 %v858_v1, %v2388_v12  ;;  %v808_v11 = vadd.f32 %v807_v0, %v759_v5  ;;  %v2428_v0 = vld [vmem:[%s2590_s6] ss:$0 sm:$0xff] }
 0x17e   : > { %v908_v6 = vadd.f32 %v907_v2, %v859_v4  ;;  %v940_v19 = vmax.f32 %v808_v11, 0.0 }
 0x180   : > { %v943_v10 = vmax.f32 %v908_v6, 0.0 }
 0x181   : > { %v760_v7 = vpop.f32.mrf.mxu2 }
 0x182   : > { %v809_v8 = vpop.f32.mrf.mxu3  ;;  %v761_v13 = vadd.f32 %v760_v7, %v2391_v16  ;;  %v963_v14 = vpack.c.bf16 %v943_v10, %v941_v9 }
 0x183   : > { %v861_v17 = vpop.f32.mrf.mxu0 }
 0x184   : > { %v810_v15 = vadd.f32 %v809_v8, %v761_v13  ;;  %v910_v18 = vpop.f32.mrf.mxu1  ;;  %1182 = vmatmul.bf16.gmra.mxu3 %v963_v14  ;;  %v862_v22 = vadd.f32 %v861_v17, %v2388_v12 }
 0x186   : > { %v942_v20 = vmax.f32 %v810_v15, 0.0  ;;  %v911_v27 = vadd.f32 %v910_v18, %v862_v22 }
 0x188   : > { %v962_v21 = vpack.c.bf16 %v942_v20, %v940_v19  ;;  %v945_v31 = vmax.f32 %v911_v27, 0.0 }
 0x189   : > { %v763_v23 = vpop.f32.mrf.mxu2 }
 0x18a   : > { %v812_v24 = vpop.f32.mrf.mxu3  ;;  %1133 = vmatmul.bf16.gmra.mxu2 %v962_v21  ;;  %v764_v29 = vadd.f32 %v763_v23, %v2391_v16 }
 0x18b   : > { %v863_v25 = vpop.f32.mrf.mxu0 }
 0x18c   : > { %v912_v26 = vpop.f32.mrf.mxu1  ;;  %v864_v28 = vadd.f32 %v863_v25, %v2388_v12  ;;  %v813_v35 = vadd.f32 %v812_v24, %v764_v29 }
 0x18e   : > { %v913_v30 = vadd.f32 %v912_v26, %v864_v28  ;;  %v944_v41 = vmax.f32 %v813_v35, 0.0 }
 0x190   : > { %v947_v32 = vmax.f32 %v913_v30, 0.0 }
 0x191   : > { %v765_v33 = vpop.f32.mrf.mxu2 }
 0x192   : > { %v814_v34 = vpop.f32.mrf.mxu3  ;;  %v766_v36 = vadd.f32 %v765_v33, %v2391_v16  ;;  %v965_v37 = vpack.c.bf16 %v947_v32, %v945_v31 }
 0x193   : > { %v866_v39 = vpop.f32.mrf.mxu0 }
 0x194   : > { %v815_v38 = vadd.f32 %v814_v34, %v766_v36  ;;  %v915_v40 = vpop.f32.mrf.mxu1  ;;  %1187 = vmatmul.bf16.gmra.mxu3 %v965_v37  ;;  %v867_v44 = vadd.f32 %v866_v39, %v2388_v12 }
 0x196   : > { %v946_v42 = vmax.f32 %v815_v38, 0.0  ;;  %v916_v48 = vadd.f32 %v915_v40, %v867_v44 }
 0x198   : > { %v964_v43 = vpack.c.bf16 %v946_v42, %v944_v41  ;;  %v949_v53 = vmax.f32 %v916_v48, 0.0 }
 0x199   : > { %v768_v45 = vpop.f32.mrf.mxu2 }
 0x19a   : > { %v817_v46 = vpop.f32.mrf.mxu3  ;;  %1138 = vmatmul.bf16.gmra.mxu2 %v964_v43  ;;  %v769_v50 = vadd.f32 %v768_v45, %v2391_v16 }
 0x19b   : > { %v868_v47 = vpop.f32.mrf.mxu0 }
 0x19c   : > { %v869_v49 = vadd.f32 %v868_v47, %v2388_v12  ;;  %v917_v51 = vpop.f32.mrf.mxu1  ;;  %v818_v56 = vadd.f32 %v817_v46, %v769_v50 }
 0x19e   : > { %v918_v52 = vadd.f32 %v917_v51, %v869_v49  ;;  %v948_v61 = vmax.f32 %v818_v56, 0.0 }
 0x1a0   : > { %v951_v54 = vmax.f32 %v918_v52, 0.0 }
 0x1a1   : > { %v770_v55 = vpop.f32.mrf.mxu2 }
 0x1a2   : > { %v771_v57 = vadd.f32 %v770_v55, %v2391_v16  ;;  %v967_v58 = vpack.c.bf16 %v951_v54, %v949_v53  ;;  %v819_v59 = vpop.f32.mrf.mxu3 }
 0x1a4   : > { %v820_v60 = vadd.f32 %v819_v59, %v771_v57  ;;  %1192 = vmatmul.bf16.gmra.mxu3 %v967_v58 }
 0x1a6   : > { %v950_v62 = vmax.f32 %v820_v60, 0.0 }
 0x1a8   : > { %v966_v63 = vpack.c.bf16 %v950_v62, %v948_v61 }
 0x1aa   : > { %1143 = vmatmul.bf16.gmra.mxu2 %v966_v63 }
 0x1b7   : > { %v1158_v12 = vpop.f32.mrf.mxu3 }
 0x1bd   : > { %v1109_v1 = vpop.f32.mrf.mxu2 }
 0x1be   : > { %v1110_v2 = vadd.f32 %v2428_v0, %v1109_v1 }
 0x1bf   : > { %v1160_v3 = vpop.f32.mrf.mxu3 }
 0x1c0   : > { %v1159_v16 = vadd.f32 %v1158_v12, %v1110_v2 }
 0x1c2   : > { %1199 = vst.msk [vmem:[%s2431_s14] sm:$0xff] %vm1198_vm1, %v1159_v16 }
 0x1c5   : > { %v1111_v4 = vpop.f32.mrf.mxu2 }
 0x1c6   : > { %v1112_v5 = vadd.f32 %v2428_v0, %v1111_v4 }
 0x1c7   : > { %v1163_v9 = vpop.f32.mrf.mxu3 }
 0x1c8   : > { %v1161_v6 = vadd.f32 %v1160_v3, %v1112_v5 }
 0x1ca   : > { %1200 = vst.msk [vmem:[%s2431_s14 + $0x8] sm:$0xff] %vm1198_vm1, %v1161_v6 }
 0x1cd   : > { %v1114_v10 = vpop.f32.mrf.mxu2 }
 0x1ce   : > { %v1115_v7 = vadd.f32 %v2428_v0, %v1114_v10 }
 0x1cf   : > { %v1165_v11 = vpop.f32.mrf.mxu3 }
 0x1d0   : > { %v1164_v8 = vadd.f32 %v1163_v9, %v1115_v7 }
 0x1d2   : > { %1201 = vst.msk [vmem:[%s2431_s14 + $0x10] sm:$0xff] %vm1198_vm1, %v1164_v8 }
 0x1d5   : > { %v1116_v13 = vpop.f32.mrf.mxu2 }
 0x1d6   : > { %v1117_v14 = vadd.f32 %v2428_v0, %v1116_v13 }
 0x1d7   : > { %v1168_v17 = vpop.f32.mrf.mxu3 }
 0x1d8   : > { %v1166_v15 = vadd.f32 %v1165_v11, %v1117_v14 }
 0x1da   : > { %1202 = vst.msk [vmem:[%s2431_s14 + $0x18] sm:$0xff] %vm1198_vm1, %v1166_v15 }
 0x1dd   : > { %v1119_v18 = vpop.f32.mrf.mxu2 }
 0x1de   : > { %v1120_v19 = vadd.f32 %v2428_v0, %v1119_v18 }
 0x1df   : > { %v1170_v21 = vpop.f32.mrf.mxu3 }
 0x1e0   : > { %v1169_v20 = vadd.f32 %v1168_v17, %v1120_v19 }
 0x1e2   : > { %1203 = vst.msk [vmem:[%s2431_s14 + $0x20] sm:$0xff] %vm1198_vm1, %v1169_v20 }
 0x1e5   : > { %v1121_v22 = vpop.f32.mrf.mxu2 }
 0x1e6   : > { %v1122_v23 = vadd.f32 %v2428_v0, %v1121_v22 }
 0x1e7   : > { %v1173_v25 = vpop.f32.mrf.mxu3 }
 0x1e8   : > { %v1171_v24 = vadd.f32 %v1170_v21, %v1122_v23 }
 0x1ea   : > { %1204 = vst.msk [vmem:[%s2431_s14 + $0x28] sm:$0xff] %vm1198_vm1, %v1171_v24 }
 0x1ed   : > { %v1124_v26 = vpop.f32.mrf.mxu2 }
 0x1ee   : > { %v1125_v27 = vadd.f32 %v2428_v0, %v1124_v26 }
 0x1ef   : > { %v1175_v29 = vpop.f32.mrf.mxu3 }
 0x1f0   : > { %v1174_v28 = vadd.f32 %v1173_v25, %v1125_v27 }
 0x1f2   : > { %1205 = vst.msk [vmem:[%s2431_s14 + $0x30] sm:$0xff] %vm1198_vm1, %v1174_v28 }
 0x1f5   : > { %v1126_v30 = vpop.f32.mrf.mxu2 }
 0x1f6   : > { %v1127_v31 = vadd.f32 %v2428_v0, %v1126_v30 }
 0x1f7   : > { %v1178_v33 = vpop.f32.mrf.mxu3 }
 0x1f8   : > { %v1176_v32 = vadd.f32 %v1175_v29, %v1127_v31 }
 0x1fa   : > { %1206 = vst.msk [vmem:[%s2431_s14 + $0x38] sm:$0xff] %vm1198_vm1, %v1176_v32 }
 0x1fd   : > { %v1129_v34 = vpop.f32.mrf.mxu2 }
 0x1fe   : > { %v1130_v35 = vadd.f32 %v2428_v0, %v1129_v34 }
 0x1ff   : > { %v1180_v37 = vpop.f32.mrf.mxu3 }
 0x200   : > { %v1179_v36 = vadd.f32 %v1178_v33, %v1130_v35 }
 0x202   : > { %1207 = vst.msk [vmem:[%s2431_s14 + $0x40] sm:$0xff] %vm1198_vm1, %v1179_v36 }
 0x205   : > { %v1131_v38 = vpop.f32.mrf.mxu2 }
 0x206   : > { %v1132_v39 = vadd.f32 %v2428_v0, %v1131_v38 }
 0x207   : > { %v1183_v41 = vpop.f32.mrf.mxu3 }
 0x208   : > { %v1181_v40 = vadd.f32 %v1180_v37, %v1132_v39 }
 0x20a   : > { %1208 = vst.msk [vmem:[%s2431_s14 + $0x48] sm:$0xff] %vm1198_vm1, %v1181_v40 }
 0x20d   : > { %v1134_v42 = vpop.f32.mrf.mxu2 }
 0x20e   : > { %v1135_v43 = vadd.f32 %v2428_v0, %v1134_v42 }
 0x20f   : > { %v1185_v45 = vpop.f32.mrf.mxu3 }
 0x210   : > { %v1184_v44 = vadd.f32 %v1183_v41, %v1135_v43 }
 0x212   : > { %1209 = vst.msk [vmem:[%s2431_s14 + $0x50] sm:$0xff] %vm1198_vm1, %v1184_v44 }
 0x215   : > { %v1136_v46 = vpop.f32.mrf.mxu2 }
 0x216   : > { %v1137_v47 = vadd.f32 %v2428_v0, %v1136_v46 }
 0x217   : > { %v1188_v49 = vpop.f32.mrf.mxu3 }
 0x218   : > { %v1186_v48 = vadd.f32 %v1185_v45, %v1137_v47 }
 0x21a   : > { %1210 = vst.msk [vmem:[%s2431_s14 + $0x58] sm:$0xff] %vm1198_vm1, %v1186_v48 }
 0x21d   : > { %v1139_v50 = vpop.f32.mrf.mxu2 }
 0x21e   : > { %v1140_v51 = vadd.f32 %v2428_v0, %v1139_v50 }
 0x21f   : > { %v1190_v53 = vpop.f32.mrf.mxu3 }
 0x220   : > { %v1189_v52 = vadd.f32 %v1188_v49, %v1140_v51 }
 0x222   : > { %1211 = vst.msk [vmem:[%s2431_s14 + $0x60] sm:$0xff] %vm1198_vm1, %v1189_v52 }
 0x225   : > { %v1141_v54 = vpop.f32.mrf.mxu2 }
 0x226   : > { %v1142_v55 = vadd.f32 %v2428_v0, %v1141_v54 }
 0x227   : > { %v1193_v57 = vpop.f32.mrf.mxu3 }
 0x228   : > { %v1191_v56 = vadd.f32 %v1190_v53, %v1142_v55 }
 0x22a   : > { %1212 = vst.msk [vmem:[%s2431_s14 + $0x68] sm:$0xff] %vm1198_vm1, %v1191_v56 }
 0x22d   : > { %v1144_v58 = vpop.f32.mrf.mxu2 }
 0x22e   : > { %v1145_v59 = vadd.f32 %v2428_v0, %v1144_v58 }
 0x22f   : > { %v1195_v63 = vpop.f32.mrf.mxu3 }
 0x230   : > { %v1194_v60 = vadd.f32 %v1193_v57, %v1145_v59 }
 0x232   : > { %1213 = vst.msk [vmem:[%s2431_s14 + $0x70] sm:$0xff] %vm1198_vm1, %v1194_v60 }
 0x235   : > { %v1146_v61 = vpop.f32.mrf.mxu2 }
 0x236   : > { %v1147_v62 = vadd.f32 %v2428_v0, %v1146_v61  ;;  %1221 = sbr.rel (!%p2036_p4) target bundleno = 619 (0x26b), region = 52 }
 0x238   : > { %v1196_v12 = vadd.f32 %v1195_v63, %v1147_v62 }
 0x23a   : > { %1214 = vst.msk [vmem:[%s2431_s14 + $0x78] sm:$0xff] %vm1198_vm1, %v1196_v12 }
 0x23b   : > { %s2602_s24 = smov (!%p1224_p8, %s1223_s24), 16 }
 0x23c   : > { %s1724_s19 = sshll.u32 %s2602_s24, 3 }
 0x23d   : > { %p1727_p9 = scmp.eq.s32.totalorder %s1724_s19, 0 }
 0x23e   : > { %s2493_s20 = sshrl.u32 (!%p1727_p9), %s2602_s24, 4 }
 0x23f   : > { %1232 = sbr.rel (%p1727_p9) target bundleno = 619 (0x26b), region = 56  ;;  %p1728_p10 = scmp.le.s32.totalorder (!%p1727_p9), %s2493_s20, 0 }
 0x244   : > { %1447 = sbr.rel (%p1728_p10) target bundleno = 602 (0x25a), region = 132  ;;  %s2593_s27 = smov (!%p1728_p10), %s2487_s18 }
 0x245   : > { %s2594_s9 = smov (!%p1728_p10), %s2431_s14  ;;  %s2502_s30 = smov (!%p1728_p10), 0  }
 0x246   : > { %s2504_s21 = smov (!%p1728_p10), 0  }
 0x249 LB: >> { %v1325_v0 = vld [vmem:[%s1945_s9] sm:$0xff]  ;;  %v1327_v1 = vld [vmem:[%s1945_s9 + $0x8] sm:$0xff]  ;;  %v1329_v2 = vld [vmem:[%s1945_s9 + $0x10] sm:$0xff]  ;;  %s1357_s23 = sadd.s32 1, %s1949_s30  ;;  %s1319_s21 = sadd.s32 1, %s1953_s21   ;;  %s1953_s21 = sphi %s2504_s21, %s1319_s21   ;;  %s1949_s30 = sphi %s2502_s30, %s2597_s30   ;;  %s1945_s9 = sphi %s2594_s9, %s2596_s9   ;;  %s1941_s27 = sphi %s2593_s27, %s2595_s27  }
 0x24a   : >> { %1326 = vst [vmem:[%s1941_s27] sm:$0xff] %v1325_v0  ;;  %v1331_v16 = vld [vmem:[%s1945_s9 + $0x18] sm:$0xff]  ;;  %p1358_p11 = scmp.ge.s32.totalorder %s1357_s23, %s2493_s20  ;;  %v1333_v3 = vld [vmem:[%s1945_s9 + $0x20] sm:$0xff]  ;;  %v1335_v4 = vld [vmem:[%s1945_s9 + $0x28] sm:$0xff]  ;;  %p1318_p12 = scmp.ge.s32.totalorder %s1319_s21, %s2493_s20 }
 0x24b   : >> { %1328 = vst [vmem:[%s1941_s27 + $0x8] sm:$0xff] %v1327_v1  ;;  %v1337_v5 = vld [vmem:[%s1945_s9 + $0x30] sm:$0xff]  ;;  %v1339_v6 = vld [vmem:[%s1945_s9 + $0x38] sm:$0xff]  ;;  %v1341_v9 = vld [vmem:[%s1945_s9 + $0x40] sm:$0xff] }
 0x24c   : >> { %1330 = vst [vmem:[%s1941_s27 + $0x10] sm:$0xff] %v1329_v2  ;;  %s2604_s23 = smov (%p1358_p11, %s1357_s23), 0  ;;  %v1343_v10 = vld [vmem:[%s1945_s9 + $0x48] sm:$0xff]  ;;  %v1345_v7 = vld [vmem:[%s1945_s9 + $0x50] sm:$0xff]  ;;  %v1347_v8 = vld [vmem:[%s1945_s9 + $0x58] sm:$0xff] }
 0x24d   : >> { %1332 = vst [vmem:[%s1941_s27 + $0x18] sm:$0xff] %v1331_v16  ;;  %s1729_s26 = sshll.u32 %s2604_s23, 7  ;;  %v1349_v11 = vld [vmem:[%s1945_s9 + $0x60] sm:$0xff]  ;;  %v1351_v13 = vld [vmem:[%s1945_s9 + $0x68] sm:$0xff]  ;;  %v1353_v14 = vld [vmem:[%s1945_s9 + $0x70] sm:$0xff]  ;;  %s2597_s30 = smov %s2604_s23 }
 0x24e   : >> { %1334 = vst [vmem:[%s1941_s27 + $0x20] sm:$0xff] %v1333_v3  ;;  %s1362_s29 = scalar_lea.vmem %s2431_s14, %s1729_s26 [#allocation2]   ;;  %s1363_s22 = scalar_lea.vmem %s2487_s18, %s1729_s26   ;;  %v1355_v15 = vld [vmem:[%s1945_s9 + $0x78] sm:$0xff] }
 0x24f   : >> { %1336 = vst [vmem:[%s1941_s27 + $0x28] sm:$0xff] %v1335_v4  ;;  %s2596_s9 = smov %s1362_s29 }
 0x250   : >> { %1338 = vst [vmem:[%s1941_s27 + $0x30] sm:$0xff] %v1337_v5 }
 0x251   : >> { %1340 = vst [vmem:[%s1941_s27 + $0x38] sm:$0xff] %v1339_v6 }
 0x252   : >> { %1342 = vst [vmem:[%s1941_s27 + $0x40] sm:$0xff] %v1341_v9 }
 0x253   : >> { %1344 = vst [vmem:[%s1941_s27 + $0x48] sm:$0xff] %v1343_v10 }
 0x254   : >> { %1346 = vst [vmem:[%s1941_s27 + $0x50] sm:$0xff] %v1345_v7 }
 0x255   : >> { %1348 = vst [vmem:[%s1941_s27 + $0x58] sm:$0xff] %v1347_v8  ;;  %1321 = sbr.rel (!%p1318_p12) target bundleno = 585 (0x249), region = 138 }
 0x256   : >> { %1350 = vst [vmem:[%s1941_s27 + $0x60] sm:$0xff] %v1349_v11 }
 0x257   : >> { %1352 = vst [vmem:[%s1941_s27 + $0x68] sm:$0xff] %v1351_v13 }
 0x258   : >> { %1354 = vst [vmem:[%s1941_s27 + $0x70] sm:$0xff] %v1353_v14 }
 0x259   : >> { %1356 = vst [vmem:[%s1941_s27 + $0x78] sm:$0xff] %v1355_v15  ;;  %s2595_s27 = smov %s1363_s22 }
 0x25a PF: > { %s2566_s10 = sand.u32 15, %s2602_s24   ;;  %s1792_s11 = sshll.u32 %s2493_s20, 7 }
 0x25b   : > { %s1368_s12 = scalar_lea.vmem %s2431_s14, %s1792_s11 [#allocation2]   ;;  %s1370_s13 = scalar_lea.vmem %s2487_s18, %s1792_s11  }
 0x25c   : > { %p1734_p13 = scmp.le.s32.totalorder %s2566_s10, 0 }
 0x25d   : > { %s1955_s15 = smov (!%p1734_p13), %s1370_s13   ;;  %s1959_s16 = smov (!%p1734_p13), %s1368_s12  }
 0x25e   : > { %1461 = sbr.rel (%p1734_p13) target bundleno = 619 (0x26b), region = 143  ;;  %s1963_s17 = smov (!%p1734_p13), 0  }
 0x25f   : > { %s1967_s19 = smov (!%p1734_p13), 0  }
 0x263 LB: >> { %v1380_v17 = vld [vmem:[%s1961_s16] sm:$0xff]  ;;  %s1382_s24 = sadd.s32 1, %s1965_s17  ;;  %s1374_s19 = sadd.s32 1, %s1969_s19   ;;  %s1969_s19 = sphi %s1967_s19, %s1374_s19   ;;  %s1965_s17 = sphi %s1963_s17, %s1964_s17   ;;  %s1961_s16 = sphi %s1959_s16, %s1387_s16   ;;  %s1957_s15 = sphi %s1955_s15, %s1388_s15  }
 0x264   : >> { %1381 = vst [vmem:[%s1957_s15] sm:$0xff] %v1380_v17  ;;  %p1383_p0 = scmp.ge.s32.totalorder %s1382_s24, %s2566_s10  ;;  %p1373_p1 = scmp.ge.s32.totalorder %s1374_s19, %s2566_s10 }
 0x266   : >> { %s2606_s24 = smov (%p1383_p0, %s1382_s24), 0  ;;  %1376 = sbr.rel (!%p1373_p1) target bundleno = 611 (0x263), region = 149 }
 0x267   : >> { %s1735_s14 = sshll.u32 %s2606_s24, 3  ;;  %s1964_s17 = smov %s2606_s24  }
 0x268   : >> { %s1387_s16 = scalar_lea.vmem %s1368_s12, %s1735_s14 [#allocation2]   ;;  %s1388_s15 = scalar_lea.vmem %s1370_s13, %s1735_s14  }
 0x26b PF: > { %p14_p2 = scmp.ge.s32.totalorder %s2026_s28, 4   ;;  %s2598_s24 = smov %s1933_s25 }
 0x26c   : > { %s2599_s25 = smov %s2034_s8  ;;  %s2600_s26 = smov %s2026_s28 }
 0x26d   :  { %16 = sbr.rel (!%p14_p2) target bundleno = 2 (0x2), region = 160 }

</bundles_post_ra>
